<compile_context>
chip_gen: v7x
topology: tpu7x:2x2x1
jax: 0.10.0
libtpu: 0.0.40
codegen_flags: <defaults>
</compile_context>

<pallas_src>
import math

import jax
import jax.numpy as jnp
from jax.experimental import pallas as pl
from jax.experimental.pallas import tpu as pltpu

HIDDEN_CHANNELS = 128
NUM_GENRES = 3
LANE = 128  # TPU lane width; genre dim is padded to this for unmasked stores.


def _round_up(v, m):
    return (v + m - 1) // m * m


# --------------------------------------------------------------------------- #
# Kernel 1: SAGEConv1 + ReLU + (eval) dropout -> h1 (bf16).
#   grid = (row tiles i, contraction tiles k over A's columns)
#   acc  = sum_k counts[i,k] @ x[k]          (f32 accumulator)
#   agg  = acc * inv_deg[i]                  (exact mean aggregation)
#   h1   = relu(agg @ W1l + x[i] @ W1r + b1)
# --------------------------------------------------------------------------- #
def sage1_kernel(a_ref, xk_ref, xi_ref, inv_ref, w1l_ref, w1r_ref, b1_ref,
                 h1_ref, acc_ref):
    k = pl.program_id(1)

    prod = jnp.dot(a_ref[...], xk_ref[...], preferred_element_type=jnp.float32)

    @pl.when(k == 0)
    def _():
        acc_ref[...] = prod            # first slice: write, don't zero+accumulate

    @pl.when(k > 0)
    def _():
        acc_ref[...] += prod

    @pl.when(k == pl.num_programs(1) - 1)
    def _():
        agg = (acc_ref[...] * inv_ref[...]).astype(jnp.bfloat16)      # (tm, C)
        h1 = (jnp.dot(agg, w1l_ref[...], preferred_element_type=jnp.float32)
              + jnp.dot(xi_ref[...], w1r_ref[...],
                        preferred_element_type=jnp.float32)
              + b1_ref[...])
        h1 = jnp.maximum(h1, 0.0)                                     # ReLU
        # TODO(synk): F.dropout is identity here (eval mode); training mode
        # would mask with pltpu.prng_seed + pltpu.prng_random_bits.
        h1_ref[...] = h1.astype(h1_ref.dtype)


# --------------------------------------------------------------------------- #
# Kernel 2: SAGEConv2 with both W2 projections fused into the epilogue.
#   acc = sum_k counts[i,k] @ h1[k]
#   out = (acc * inv_deg[i]) @ W2l + h1[i] @ W2r + b2    (genres padded to 128)
# --------------------------------------------------------------------------- #
def sage2_kernel(a_ref, hk_ref, hi_ref, inv_ref, w2l_ref, w2r_ref, b2_ref,
                 o_ref, acc_ref):
    k = pl.program_id(1)

    prod = jnp.dot(a_ref[...], hk_ref[...], preferred_element_type=jnp.float32)

    @pl.when(k == 0)
    def _():
        acc_ref[...] = prod

    @pl.when(k > 0)
    def _():
        acc_ref[...] += prod

    @pl.when(k == pl.num_programs(1) - 1)
    def _():
        agg = (acc_ref[...] * inv_ref[...]).astype(jnp.bfloat16)      # (tm, C)
        out = (jnp.dot(agg, w2l_ref[...], preferred_element_type=jnp.float32)
               + jnp.dot(hi_ref[...], w2r_ref[...],
                         preferred_element_type=jnp.float32)
               + b2_ref[...])
        o_ref[...] = out.astype(o_ref.dtype)


# --------------------------------------------------------------------------- #
# Plain-JAX glue.
# --------------------------------------------------------------------------- #
def build_adjacency(edge_index, num_nodes, npad):
    """Padded bf16 edge-count matrix + f32 1/in_degree column.

    Counts are small integers (exact in bf16); the mean normalization is done
    in f32 inside the kernel epilogue, so aggregation weights carry no bf16
    rounding error.
    """
    del num_nodes  # edge indices are < num_nodes <= npad by construction
    src = edge_index[0]
    dst = edge_index[1]
    one_bf = jnp.asarray(1.0, jnp.bfloat16)
    counts = jnp.zeros((npad, npad), jnp.bfloat16).at[dst, src].add(one_bf)
    deg = jnp.zeros((npad,), jnp.float32).at[dst].add(1.0)
    inv_deg = jnp.where(deg > 0, 1.0 / deg, 0.0).reshape(npad, 1)
    return counts, inv_deg


def gnn_forward(x, edge_index, params, *, tm=256, tk=512):
    n, c = x.shape
    g = params["w2l"].shape[1]
    gp = LANE                                    # lane-dense genre width

    # --- tile-size selection ---------------------------------------------- #
    npad0 = _round_up(n, 128)
    tk = max(128, min(tk, npad0))                # contraction tile (>=256 fills
    tm = max(128, min(tm, npad0))                #  the 256-deep MXU on v6e/v7x)
    if npad0 >= 256:
        # Keep >= 2 row tiles so both v7x TensorCores get work on the
        # "parallel" grid axis.
        tm = min(tm, max(128, (npad0 // 2) // 128 * 128))
    npad = _round_up(npad0, math.lcm(tm, tk))

    # --- operands (bf16 MXU inputs, f32 scales/biases) ---------------------- #
    a_bf, inv_deg = build_adjacency(edge_index, n, npad)
    x_bf = jnp.pad(x, ((0, npad - n), (0, 0))).astype(jnp.bfloat16)

    w1l = params["w1l"].astype(jnp.bfloat16)                          # (C, C)
    w1r = params["w1r"].astype(jnp.bfloat16)                          # (C, C)
    b1 = params["b1"].astype(jnp.float32)                             # (1, C)
    w2l = jnp.pad(params["w2l"], ((0, 0), (0, gp - g))).astype(jnp.bfloat16)
    w2r = jnp.pad(params["w2r"], ((0, 0), (0, gp - g))).astype(jnp.bfloat16)
    b2 = jnp.pad(params["b2"], ((0, 0), (0, gp - g))).astype(jnp.float32)

    grid = (npad // tm, npad // tk)
    cparams = pltpu.CompilerParams(
        dimension_semantics=("parallel", "arbitrary"))

    # ---- Layer 1 (+ ReLU + eval-dropout) -> h1 (bf16) ---------------------- #
    h1 = pl.pallas_call(
        sage1_kernel,
        out_shape=jax.ShapeDtypeStruct((npad, c), jnp.bfloat16),
        grid_spec=pltpu.PrefetchScalarGridSpec(
            num_scalar_prefetch=0,
            grid=grid,
            in_specs=[
                pl.BlockSpec((tm, tk), lambda i, k: (i, k)),   # A counts tile
                pl.BlockSpec((tk, c), lambda i, k: (k, 0)),    # x rows (contraction)
                pl.BlockSpec((tm, c), lambda i, k: (i, 0)),    # x rows (self/root)
                pl.BlockSpec((tm, 1), lambda i, k: (i, 0)),    # 1/deg
                pl.BlockSpec((c, c), lambda i, k: (0, 0)),     # W1l
                pl.BlockSpec((c, c), lambda i, k: (0, 0)),     # W1r
                pl.BlockSpec((1, c), lambda i, k: (0, 0)),     # b1
            ],
            out_specs=pl.BlockSpec((tm, c), lambda i, k: (i, 0)),
            scratch_shapes=[pltpu.VMEM((tm, c), jnp.float32)],
        ),
        compiler_params=cparams,
    )(a_bf, x_bf, x_bf, inv_deg, w1l, w1r, b1)

    # ---- Layer 2 (aggregation + both W2 projections + b2 in epilogue) ------ #
    out_pad = pl.pallas_call(
        sage2_kernel,
        out_shape=jax.ShapeDtypeStruct((npad, gp), jnp.float32),
        grid_spec=pltpu.PrefetchScalarGridSpec(
            num_scalar_prefetch=0,
            grid=grid,
            in_specs=[
                pl.BlockSpec((tm, tk), lambda i, k: (i, k)),   # A counts tile
                pl.BlockSpec((tk, c), lambda i, k: (k, 0)),    # h1 rows (contraction)
                pl.BlockSpec((tm, c), lambda i, k: (i, 0)),    # h1 rows (self/root)
                pl.BlockSpec((tm, 1), lambda i, k: (i, 0)),    # 1/deg
                pl.BlockSpec((c, gp), lambda i, k: (0, 0)),    # W2l (padded)
                pl.BlockSpec((c, gp), lambda i, k: (0, 0)),    # W2r (padded)
                pl.BlockSpec((1, gp), lambda i, k: (0, 0)),    # b2 (padded)
            ],
            out_specs=pl.BlockSpec((tm, gp), lambda i, k: (i, 0)),
            scratch_shapes=[pltpu.VMEM((tm, c), jnp.float32)],
        ),
        compiler_params=cparams,
    )(a_bf, h1, h1, inv_deg, w2l, w2r, b2)

    return out_pad[:n, :g]


def gnn_reference(x, edge_index, params):
    """Pure f32 JAX reference (PyG SAGEConv semantics) for validation."""
    n = x.shape[0]
    src, dst = edge_index[0], edge_index[1]
    adj = jnp.zeros((n, n), jnp.float32).at[dst, src].add(1.0)
    deg = jnp.sum(adj, axis=1, keepdims=True)
    a = adj * jnp.where(deg > 0, 1.0 / deg, 0.0)
    h1 = jnp.maximum(a @ x @ params["w1l"] + x @ params["w1r"] + params["b1"], 0.0)
    return a @ h1 @ params["w2l"] + h1 @ params["w2r"] + params["b2"]


def init_params(key, hidden, num_genres):
    ks = jax.random.split(key, 6)
    s1 = 1.0 / jnp.sqrt(hidden)
    # Weights stored (in, out), i.e. already transposed vs. torch Linear (out, in).
    return {
        "w1l": jax.random.uniform(ks[0], (hidden, hidden), jnp.float32, -s1, s1),
        "w1r": jax.random.uniform(ks[1], (hidden, hidden), jnp.float32, -s1, s1),
        "b1":  jax.random.uniform(ks[2], (1, hidden), jnp.float32, -s1, s1),
        "w2l": jax.random.uniform(ks[3], (hidden, num_genres), jnp.float32, -s1, s1),
        "w2r": jax.random.uniform(ks[4], (hidden, num_genres), jnp.float32, -s1, s1),
        "b2":  jax.random.uniform(ks[5], (1, num_genres), jnp.float32, -s1, s1),
    }


if __name__ == "__main__":
    key = jax.random.PRNGKey(0)
    k_x, k_e, k_p = jax.random.split(key, 3)

    num_nodes = 256
    num_edges = 1024

    x = jax.random.normal(k_x, (num_nodes, HIDDEN_CHANNELS), jnp.float32)
    edge_index = jax.random.randint(k_e, (2, num_edges), 0, num_nodes, jnp.int32)
    params = init_params(k_p, HIDDEN_CHANNELS, NUM_GENRES)

    out = jax.block_until_ready(gnn_forward(x, edge_index, params))
    assert out.shape == (num_nodes, NUM_GENRES)
    assert bool(jnp.all(jnp.isfinite(out)))

    ref = gnn_reference(x, edge_index, params)
    max_err = float(jnp.max(jnp.abs(out - ref)))
    assert max_err < 0.1, f"max abs err vs f32 reference: {max_err}"
    print("KERNEL_OK")
</pallas_src>

<mosaic_0001>
module attributes {stable_mosaic.version = 11 : i64} {
  func.func @sage1_kernel(%arg0: i32, %arg1: i32, %arg2: memref<128x256xbf16, #tpu.memory_space<vmem>>, %arg3: memref<256x128xbf16, #tpu.memory_space<vmem>>, %arg4: memref<128x128xbf16, #tpu.memory_space<vmem>>, %arg5: memref<128x1xf32, #tpu.memory_space<vmem>>, %arg6: memref<128x128xbf16, #tpu.memory_space<vmem>>, %arg7: memref<128x128xbf16, #tpu.memory_space<vmem>>, %arg8: memref<1x128xf32, #tpu.memory_space<vmem>>, %arg9: memref<128x128xbf16, #tpu.memory_space<vmem>>, %arg10: memref<128x128xf32, #tpu.memory_space<vmem>>) attributes {dimension_semantics = [#tpu.dimension_semantics<parallel>, #tpu.dimension_semantics<arbitrary>], iteration_bounds = array<i64: 2, 1>, scalar_prefetch = 0 : i64, scratch_operands = 1 : i64, tpu.core_type = #tpu.core_type<tc>, window_params = [{transform_indices = @transform_0, window_bounds = array<i64: 128, 256>}, {transform_indices = @transform_1, window_bounds = array<i64: 256, 128>}, {transform_indices = @transform_2, window_bounds = array<i64: 128, 128>}, {transform_indices = @transform_3, window_bounds = array<i64: 128, 1>}, {pipeline_mode = #tpu.pipeline_mode<synchronous>, transform_indices = @transform_4, window_bounds = array<i64: 128, 128>}, {pipeline_mode = #tpu.pipeline_mode<synchronous>, transform_indices = @transform_5, window_bounds = array<i64: 128, 128>}, {pipeline_mode = #tpu.pipeline_mode<synchronous>, transform_indices = @transform_6, window_bounds = array<i64: 1, 128>}, {transform_indices = @transform_7, window_bounds = array<i64: 128, 128>}]} {
    %c0 = arith.constant 0 : index
    %c0_0 = arith.constant 0 : index
    %0 = vector.load %arg2[%c0, %c0_0] : memref<128x256xbf16, #tpu.memory_space<vmem>>, vector<128x256xbf16>
    %c0_1 = arith.constant 0 : index
    %c0_2 = arith.constant 0 : index
    %1 = vector.load %arg3[%c0_1, %c0_2] : memref<256x128xbf16, #tpu.memory_space<vmem>>, vector<256x128xbf16>
    %cst = arith.constant dense<0.000000e+00> : vector<128x128xf32>
    %2 = tpu.matmul %0, %1, %cst {dimension_numbers = #tpu.dot_dimension_numbers<[1], [0], [0], [1], [0, 0, 1, 1], [], []>} : vector<128x256xbf16>, vector<256x128xbf16>, vector<128x128xf32> -> vector<128x128xf32>
    %c0_i32 = arith.constant 0 : i32
    %3 = arith.cmpi eq, %arg1, %c0_i32 : i32
    %4 = arith.extui %3 : i1 to i32
    %c0_i32_3 = arith.constant 0 : i32
    %5 = arith.cmpi ne, %4, %c0_i32_3 : i32
    scf.if %5 {
      %c0_8 = arith.constant 0 : index
      %c0_9 = arith.constant 0 : index
      %12 = vector.load %arg10[%c0_8, %c0_9] : memref<128x128xf32, #tpu.memory_space<vmem>>, vector<128x128xf32>
      tpu.vector_store %arg10[%c0_8, %c0_9], %2 {strides = array<i32>} : memref<128x128xf32, #tpu.memory_space<vmem>>, vector<128x128xf32>,
    } else {
    }
    %c0_i32_4 = arith.constant 0 : i32
    %6 = arith.cmpi sgt, %arg1, %c0_i32_4 : i32
    %7 = arith.extui %6 : i1 to i32
    %c0_i32_5 = arith.constant 0 : i32
    %8 = arith.cmpi ne, %7, %c0_i32_5 : i32
    scf.if %8 {
      %c0_8 = arith.constant 0 : index
      %c0_9 = arith.constant 0 : index
      %12 = vector.load %arg10[%c0_8, %c0_9] : memref<128x128xf32, #tpu.memory_space<vmem>>, vector<128x128xf32>
      %13 = arith.addf %12, %2 : vector<128x128xf32>
      %c0_10 = arith.constant 0 : index
      %c0_11 = arith.constant 0 : index
      %14 = vector.load %arg10[%c0_10, %c0_11] : memref<128x128xf32, #tpu.memory_space<vmem>>, vector<128x128xf32>
      tpu.vector_store %arg10[%c0_10, %c0_11], %13 {strides = array<i32>} : memref<128x128xf32, #tpu.memory_space<vmem>>, vector<128x128xf32>,
    } else {
    }
    %c0_i32_6 = arith.constant 0 : i32
    %9 = arith.cmpi eq, %arg1, %c0_i32_6 : i32
    %10 = arith.extui %9 : i1 to i32
    %c0_i32_7 = arith.constant 0 : i32
    %11 = arith.cmpi ne, %10, %c0_i32_7 : i32
    scf.if %11 {
      %c0_8 = arith.constant 0 : index
      %c0_9 = arith.constant 0 : index
      %12 = vector.load %arg10[%c0_8, %c0_9] : memref<128x128xf32, #tpu.memory_space<vmem>>, vector<128x128xf32>
      %c0_10 = arith.constant 0 : index
      %c0_11 = arith.constant 0 : index
      %13 = vector.load %arg5[%c0_10, %c0_11] : memref<128x1xf32, #tpu.memory_space<vmem>>, vector<128x1xf32>
      %14 = vector.broadcast %13 : vector<128x1xf32> to vector<128x128xf32>
      %15 = arith.mulf %12, %14 : vector<128x128xf32>
      %16 = arith.truncf %15 : vector<128x128xf32> to vector<128x128xbf16>
      %c0_12 = arith.constant 0 : index
      %c0_13 = arith.constant 0 : index
      %17 = vector.load %arg6[%c0_12, %c0_13] : memref<128x128xbf16, #tpu.memory_space<vmem>>, vector<128x128xbf16>
      %cst_14 = arith.constant dense<0.000000e+00> : vector<128x128xf32>
      %18 = tpu.matmul %16, %17, %cst_14 {dimension_numbers = #tpu.dot_dimension_numbers<[1], [0], [0], [1], [0, 0, 1, 1], [], []>} : vector<128x128xbf16>, vector<128x128xbf16>, vector<128x128xf32> -> vector<128x128xf32>
      %c0_15 = arith.constant 0 : index
      %c0_16 = arith.constant 0 : index
      %19 = vector.load %arg4[%c0_15, %c0_16] : memref<128x128xbf16, #tpu.memory_space<vmem>>, vector<128x128xbf16>
      %c0_17 = arith.constant 0 : index
      %c0_18 = arith.constant 0 : index
      %20 = vector.load %arg7[%c0_17, %c0_18] : memref<128x128xbf16, #tpu.memory_space<vmem>>, vector<128x128xbf16>
      %cst_19 = arith.constant dense<0.000000e+00> : vector<128x128xf32>
      %21 = tpu.matmul %19, %20, %cst_19 {dimension_numbers = #tpu.dot_dimension_numbers<[1], [0], [0], [1], [0, 0, 1, 1], [], []>} : vector<128x128xbf16>, vector<128x128xbf16>, vector<128x128xf32> -> vector<128x128xf32>
      %22 = arith.addf %18, %21 : vector<128x128xf32>
      %c0_20 = arith.constant 0 : index
      %c0_21 = arith.constant 0 : index
      %23 = vector.load %arg8[%c0_20, %c0_21] : memref<1x128xf32, #tpu.memory_space<vmem>>, vector<1x128xf32>
      %24 = vector.broadcast %23 : vector<1x128xf32> to vector<128x128xf32>
      %25 = arith.addf %22, %24 : vector<128x128xf32>
      %cst_22 = arith.constant 0.000000e+00 : f32
      %26 = vector.broadcast %cst_22 : f32 to vector<128x128xf32>
      %27 = arith.maximumf %25, %26 : vector<128x128xf32>
      %28 = arith.truncf %27 : vector<128x128xf32> to vector<128x128xbf16>
      %c0_23 = arith.constant 0 : index
      %c0_24 = arith.constant 0 : index
      %29 = vector.load %arg9[%c0_23, %c0_24] : memref<128x128xbf16, #tpu.memory_space<vmem>>, vector<128x128xbf16>
      tpu.vector_store %arg9[%c0_23, %c0_24], %28 {strides = array<i32>} : memref<128x128xbf16, #tpu.memory_space<vmem>>, vector<128x128xbf16>,
    } else {
    }
    return
  }
  func.func @transform_0(%arg0: i32, %arg1: i32) -> (i32, i32) {
    %c0_i32 = arith.constant 0 : i32
    return %arg0, %arg1 : i32, i32
  }
  func.func @transform_1(%arg0: i32, %arg1: i32) -> (i32, i32) {
    %c0_i32 = arith.constant 0 : i32
    %c0_i32_0 = arith.constant 0 : i32
    return %arg1, %c0_i32 : i32, i32
  }
  func.func @transform_2(%arg0: i32, %arg1: i32) -> (i32, i32) {
    %c0_i32 = arith.constant 0 : i32
    %c0_i32_0 = arith.constant 0 : i32
    return %arg0, %c0_i32 : i32, i32
  }
  func.func @transform_3(%arg0: i32, %arg1: i32) -> (i32, i32) {
    %c0_i32 = arith.constant 0 : i32
    %c0_i32_0 = arith.constant 0 : i32
    return %arg0, %c0_i32 : i32, i32
  }
  func.func @transform_4(%arg0: i32, %arg1: i32) -> (i32, i32) {
    %c0_i32 = arith.constant 0 : i32
    %c0_i32_0 = arith.constant 0 : i32
    %c0_i32_1 = arith.constant 0 : i32
    return %c0_i32, %c0_i32_0 : i32, i32
  }
  func.func @transform_5(%arg0: i32, %arg1: i32) -> (i32, i32) {
    %c0_i32 = arith.constant 0 : i32
    %c0_i32_0 = arith.constant 0 : i32
    %c0_i32_1 = arith.constant 0 : i32
    return %c0_i32, %c0_i32_0 : i32, i32
  }
  func.func @transform_6(%arg0: i32, %arg1: i32) -> (i32, i32) {
    %c0_i32 = arith.constant 0 : i32
    %c0_i32_0 = arith.constant 0 : i32
    %c0_i32_1 = arith.constant 0 : i32
    return %c0_i32, %c0_i32_0 : i32, i32
  }
  func.func @transform_7(%arg0: i32, %arg1: i32) -> (i32, i32) {
    %c0_i32 = arith.constant 0 : i32
    %c0_i32_0 = arith.constant 0 : i32
    return %arg0, %c0_i32 : i32, i32
  }
}

</mosaic_0001>

<bundles_post_ra>
// kernel: tpu_custom_call.1
= control target key start
LH: loop header
LB: loop body
LE: loop exit
PB: predicated region body
PF: predicated region fallthrough
CT: control target
= control target key end

     0   :  { %s2738_s0 = inlined_call_operand.vmem [shape: bf16[256,256], index: 0, kind: input, shape index: {}]   ;;  %s2739_s1 = inlined_call_operand.hbm [shape: bf16[256,128], index: 1, kind: input, shape index: {}]   ;;  %s2740_s2 = inlined_call_operand.hbm [shape: bf16[256,128], index: 2, kind: input, shape index: {}]   ;;  %s2741_s3 = inlined_call_operand.vmem [shape: f32[256,1], index: 3, kind: input, shape index: {}]   ;;  %s2742_s4 = inlined_call_operand.hbm [shape: bf16[128,128], index: 4, kind: input, shape index: {}]   ;;  %s2743_s5 = inlined_call_operand.hbm [shape: bf16[128,128], index: 5, kind: input, shape index: {}]   ;;  %s2744_s6 = inlined_call_operand.vmem [shape: f32[1,128], index: 6, kind: input, shape index: {}]   ;;  %s2745_s7 = inlined_call_operand.hbm [shape: bf16[256,128], index: 7, kind: output, shape index: {}]  }
   0x1   :  { %2756 = sst [smem:[#allocation20_spill]] %s2744_s6 }
   0x2   :  { %2757 = sst [smem:[#allocation21_spill]] %s2745_s7 }
   0x3   :  { %12 = vsyncpa [#allocation4], 0 }
   0x4   :  { %13 = vsyncpa [#allocation7], 0 }
   0x5   :  { %15 = vsyncpa [#allocation7 + $0x1], 0 }
   0x6   :  { %16 = vsyncpa [#allocation10], 0 }
   0x7   :  { %17 = vsyncpa [#allocation5], 0 }
   0x8   :  { %19 = vsyncpa [#allocation5 + $0x1], 0  ;;  %s2388_s24 = smov 0   ;;  %s2390_s25 = smov 0  }
   0x9   :  { %s2392_s26 = smov 0   ;;  %s2394_s27 = smov 0  }
   0xa   :  { %s2396_s28 = smov 0   ;;  %s2398_s29 = smov 0  }
   0xb LB: > { %2758 = sst [smem:[#allocation17_spill]] %s2316_s24  ;;  %s2419_s30 = sadd.s32 4294967295, %s2336_s29   ;;  %s2336_s29 = sphi %s2398_s29, %s25_s29   ;;  %s2332_s28 = sphi %s2396_s28, %s2790_s28   ;;  %s2328_s27 = sphi %s2394_s27, %s2789_s27   ;;  %s2324_s26 = sphi %s2392_s26, %s2788_s26   ;;  %s2320_s25 = sphi %s2390_s25, %s2787_s25   ;;  %s2316_s24 = sphi %s2388_s24, %s2786_s24  }
   0xc   : > { %s1624_s8 = sadd.s32 4294967294, %s2336_s29   ;;  %p105_p0 = scmp.ne.s32.totalorder %s2324_s26, %s2320_s25 }
   0xd   : > { %p106_p1 = scmp.eq.s32.totalorder %s2336_s29, 0  ;;  %p111_p2 = scmp.ne.s32.totalorder %s2320_s25, %s2316_s24 }
   0xe   : > { %p2746_p3 = scmp.eq.s32.totalorder %s2419_s30, 0  ;;  %p224_p5 = scmp.eq.s32.totalorder %s2419_s30, 1 }
   0xf   : > { %p2428_p4 = por %p106_p1, %p105_p0  ;;  %p230_p7 = scmp.eq.s32.totalorder %s1624_s8, 1 }
  0x10   : > { %p2435_p6 = por %p2746_p3, %p111_p2  ;;  %p2439_p8 = por %p224_p5, %p105_p0 }
  0x11   : > { %p1625_p9 = scmp.ge.s32.totalorder %s2336_s29, 1  ;;  %p2444_p10 = por %p230_p7, %p111_p2 }
  0x12   : > { %s2760_s10 = scalar_select %p2435_p6, 1, 0 }
  0x13   : > { %s2761_s11 = scalar_select %p2439_p8, 1, 0 }
  0x14   : > { %s2763_s12 = scalar_select %p2444_p10, 1, 0 }
  0x15   : > { %2762 = sst [smem:[#allocation18_spill]] %s2761_s11  ;;  %p237_p11 = scmp.lt.s32.totalorder %s2336_s29, 3 }
  0x16   : > { %2764 = sst [smem:[#allocation19_spill]] %s2763_s12  ;;  %s2338_s14 = smov [#allocation8]  }
  0x17   : > { %p2449_p12 = pnand %p1625_p9, %p237_p11  ;;  %s265_s15 = sshll.u32 %s2338_s14, 4  ;;  %s266_s15 = int_to_ptr.vmem [resolvable:$true] %s265_s15 }
  0x18   : > { %p2001_p0 = scmp.lt.s32.totalorder %s2336_s29, 2  ;;  %s2128_s20 = scalar_lea.hbm %s2742_s4, 1024 }
  0x19   : > { %s2765_s13 = scalar_select %p2449_p12, 1, 0 }
  0x1a   : > { %p1980_p1 = pneg %p2449_p12  ;;  %p2465_p2 = pnand %p2001_p0, %p2428_p4 }
  0x1b   : > { %p2129_p7 = scmp.ne.s32.totalorder %s2742_s4, %s2128_s20 }
  0x1c   : > { %p2459_p5 = pnand %p1980_p1, %p2746_p3  ;;  %p2135_p1 = scmp.lt.u32.totalorder %s2128_s20, %s2742_s4 }
  0x1d   : > { %s2767_s17 = scalar_select %p2465_p2, 1, 0 }
  0x1e   : > { %p2477_p9 = pneg %p2459_p5 }
  0x20   : > { %p2131_p11 = pnand %p2477_p9, %p2129_p7 }
  0x22   : > { %p2132_p4 = pneg %p2131_p11 }
  0x24   : > { %p2137_p0 = pnand %p2135_p1, %p2132_p4 }
  0x26   : > { %2140 = shalt.err (!%p2137_p0)
}
  0x27   : > { %s2141_s14 = scalar_lea.vmem %s266_s15, 1024  ;;  %p2149_p8 = scmp.lt.s32.totalorder %s266_s15, %s266_s15 }
  0x28   : > { %p2142_p13 = scmp.ne.s32.totalorder %s266_s15, %s2141_s14  ;;  %p2150_p6 = scmp.lt.s32.totalorder %s2141_s14, %s2141_s14 }
  0x2a   : > { %p2144_p3 = pnand %p2142_p13, %p2477_p9  ;;  %p2151_p12 = por %p2150_p6, %p2149_p8 }
  0x2c   : > { %p2145_p10 = pneg %p2144_p3 }
  0x2e   : > { %p2152_p2 = pnand %p2151_p12, %p2145_p10 }
  0x30   : > { %2155 = shalt.err (!%p2152_p2)
}
  0x31   : > { %s2339_s18 = smov 64   ;;  %s2340_s19 = smov 4  }
  0x32   : > { %1986 = dma.hbm_to_vmem [thread:$0]  (!%p2459_p5), %s2742_s4, 1024, %s266_s15, [#allocation7], %s2339_s18, %s2339_s18, %s2340_s19  }
  0x33   : > { %s2341_s22 = smov [#allocation3]   ;;  %s2156_s12 = scalar_lea.hbm %s2739_s1, 2048 }
  0x34   : > { %s252_s8 = sshll.u32 %s2341_s22, 4  ;;  %p2157_p3 = scmp.ne.s32.totalorder %s2739_s1, %s2156_s12  ;;  %s253_s8 = int_to_ptr.vmem [resolvable:$true] %s252_s8 }
  0x35   : > { %p2163_p10 = scmp.lt.u32.totalorder %s2156_s12, %s2739_s1 }
  0x36   : > { %p2159_p6 = pnand %p2157_p3, %p2477_p9 }
  0x38   : > { %p2160_p8 = pneg %p2159_p6 }
  0x3a   : > { %p2165_p12 = pnand %p2163_p10, %p2160_p8 }
  0x3c   : > { %2168 = shalt.err (!%p2165_p12)
}
  0x3d   : > { %s2169_s15 = scalar_lea.vmem %s253_s8, 2048  ;;  %p2177_p11 = scmp.lt.s32.totalorder %s253_s8, %s253_s8 }
  0x3e   : > { %p2170_p13 = scmp.ne.s32.totalorder %s253_s8, %s2169_s15  ;;  %p2178_p4 = scmp.lt.s32.totalorder %s2169_s15, %s2169_s15 }
  0x40   : > { %p2172_p2 = pnand %p2170_p13, %p2477_p9  ;;  %p2179_p1 = por %p2178_p4, %p2177_p11 }
  0x42   : > { %p2173_p7 = pneg %p2172_p2 }
  0x44   : > { %p2180_p0 = pnand %p2179_p1, %p2173_p7 }
  0x46   : > { %2183 = shalt.err (!%p2180_p0)
}
  0x47   : > { %1983 = dma.hbm_to_vmem [thread:$0]  (!%p2459_p5), %s2739_s1, 2048, %s253_s8, [#allocation4], %s2339_s18, %s2339_s18, %s2340_s19  }
  0x48   : > { %s2342_s24 = smov [#allocation9]   ;;  %s2184_s21 = scalar_lea.hbm %s2743_s5, 1024 }
  0x49   : > { %s278_s11 = sshll.u32 %s2342_s24, 4  ;;  %p2185_p3 = scmp.ne.s32.totalorder %s2743_s5, %s2184_s21  ;;  %s279_s11 = int_to_ptr.vmem [resolvable:$true] %s278_s11 }
  0x4a   : > { %p2191_p10 = scmp.lt.u32.totalorder %s2184_s21, %s2743_s5 }
  0x4b   : > { %p2187_p6 = pnand %p2185_p3, %p2477_p9 }
  0x4d   : > { %p2188_p8 = pneg %p2187_p6 }
  0x4f   : > { %p2193_p12 = pnand %p2191_p10, %p2188_p8 }
  0x51   : > { %2196 = shalt.err (!%p2193_p12)
}
  0x52   : > { %s2197_s8 = scalar_lea.vmem %s279_s11, 1024  ;;  %p2205_p11 = scmp.lt.s32.totalorder %s279_s11, %s279_s11 }
  0x53   : > { %p2198_p13 = scmp.ne.s32.totalorder %s279_s11, %s2197_s8  ;;  %p2206_p4 = scmp.lt.s32.totalorder %s2197_s8, %s2197_s8 }
  0x55   : > { %p2200_p2 = pnand %p2198_p13, %p2477_p9  ;;  %p2207_p1 = por %p2206_p4, %p2205_p11 }
  0x57   : > { %p2201_p7 = pneg %p2200_p2 }
  0x59   : > { %p2208_p0 = pnand %p2207_p1, %p2201_p7 }
  0x5b   : > { %2211 = shalt.err (!%p2208_p0)
}
  0x5c   : > { %1989 = dma.hbm_to_vmem [thread:$0]  (!%p2459_p5), %s2743_s5, 1024, %s279_s11, [#allocation10], %s2339_s18, %s2339_s18, %s2340_s19  }
  0x5d   : > { %s37_s23 = sadd.s32 1, %s2332_s28  ;;  %s98_s24 = sadd.s32 1, %s2324_s26 }
  0x5e   : > { %p39_p9 = scmp.ge.s32.totalorder %s37_s23, 2  ;;  %s310_s12 = sand.u32 1, %s2336_s29  }
  0x5f   : > { %s312_s16 = sand.u32 1, %s2324_s26   ;;  %s1722_s21 = sshll.u32 %s2332_s28, 10 }
  0x60   : > { %s2792_s23 = smov (%p39_p9, %s37_s23), 0  ;;  %s1630_s20 = sshll.u32 %s312_s16, 6 }
  0x61   : > { %s95_s22 = ssub.s32 %s2332_s28, %s2792_s23  ;;  %s2550_s15 = scalar_lea.hbm %s2740_s2, %s1722_s21 }
  0x62   : > { %p96_p3 = scmp.eq.s32.totalorder %s95_s22, 0  ;;  %s314_s11 = scalar_lea.vmem [#allocation6], %s1630_s20 }
  0x63   : > { %s321_s8 = sshll.u32 %s314_s11, 4  ;;  %s2557_s7 = scalar_lea.sflag [#allocation7], %s310_s12  ;;  %s2555_s8 = int_to_ptr.vmem [resolvable:$true] %s321_s8 }
  0x64   : > { %s2553_s6 = scalar_select %p96_p3, %s2324_s26, %s98_s24  }
  0x65   : > { %s2212_s16 = scalar_lea.hbm %s2550_s15, 1024  ;;  %p2769_p6 = scmp.ne.s32.totalorder %s2767_s17, 0 }
  0x66   : > { %p2213_p5 = scmp.ne.s32.totalorder %s2550_s15, %s2212_s16  ;;  %s2217_s9 = scalar_lea.hbm %s2740_s2, 2048 }
  0x67   : > { %p2214_p8 = pneg %p2769_p6  ;;  %p2218_p13 = scmp.lt.u32.totalorder %s2550_s15, %s2740_s2 }
  0x68   : > { %p2219_p2 = scmp.lt.u32.totalorder %s2217_s9, %s2212_s16  ;;  %p2221_p11 = scmp.lt.u32.totalorder %s2212_s16, %s2550_s15 }
  0x69   : > { %p2215_p10 = pnand %p2214_p8, %p2213_p5 }
  0x6a   : > { %p2220_p7 = por %p2219_p2, %p2218_p13 }
  0x6b   : > { %p2216_p12 = pneg %p2215_p10 }
  0x6c   : > { %p2222_p4 = por %p2221_p11, %p2220_p7 }
  0x6e   : > { %p2223_p1 = pnand %p2222_p4, %p2216_p12 }
  0x70   : > { %2226 = shalt.err (!%p2223_p1)
}
  0x71   : > { %s2227_s24 = scalar_lea.vmem %s2555_s8, 1024  ;;  %s2343_s12 = smov [#allocation6]  }
  0x72   : > { %p2228_p0 = scmp.ne.s32.totalorder %s2555_s8, %s2227_s24  ;;  %s2232_s11 = sshll.u32 %s2343_s12, 4  ;;  %s2233_s11 = int_to_ptr.vmem [resolvable:$false] %s2232_s11 }
  0x73   : > { %s2234_s21 = scalar_lea.vmem %s2233_s11, 2048  ;;  %p2235_p5 = scmp.lt.s32.totalorder %s2555_s8, %s2233_s11 }
  0x74   : > { %p2230_p9 = pnand %p2228_p0, %p2214_p8  ;;  %p2236_p10 = scmp.lt.s32.totalorder %s2234_s21, %s2227_s24 }
  0x76   : > { %p2231_p3 = pneg %p2230_p9  ;;  %p2237_p13 = por %p2236_p10, %p2235_p5 }
  0x78   : > { %p2238_p2 = pnand %p2237_p13, %p2231_p3 }
  0x7a   : > { %2241 = shalt.err (!%p2238_p2)
}
  0x7b   : > { %1993 = dma.hbm_to_vmem [thread:$0]  (!%p2769_p6), %s2550_s15, 1024, %s2555_s8, %s2557_s7, %s2339_s18, %s2339_s18, %s2340_s19  }
  0x7c   : > { %p2770_p8 = scmp.ne.s32.totalorder %s2765_s13, 0 }
  0x7d   : > { %p2771_p12 = scmp.eq.s32.totalorder (!%p2770_p8), %s2419_s30, 0 }
  0x7e   : > { %342 = sbr.rel (%p2770_p8) target bundleno = 692 (0x2b4), region = 48 }
  0x85   : > { %2295 = dma.done.wait (%p2771_p12), [#allocation4], 2048   ;;  %p2772_p7 = pmov %p2771_p12 }
  0x86   : > { %s348_s17 = sand.u32 1, %s2419_s30   ;;  %s350_s16 = sand.u32 1, %s2320_s25  }
  0x87   : > { %2297 = vsyncadd (%p2772_p7), [#allocation4], 4294965248  ;;  %s2598_s22 = sshll.u32 %s350_s16, 6  ;;  %s349_s18 = scalar_lea.sflag [#allocation7], %s348_s17 }
  0x88   : > { %s2601_s19 = scalar_lea.vmem [#allocation6], %s2598_s22  ;;  %p2773_p6 = scmp.ne.s32.totalorder %s2760_s10, 0 }
  0x8a   : > { %2299 = dma.done.wait (%p2773_p6), %s349_s18, 1024  }
  0x8b   : > { %2301 = vsyncadd (%p2773_p6), %s349_s18, 4294966272  ;;  %p2774_p11 = pmov %p2772_p7 }
  0x8c   : > { %p2775_p4 = pmov %p2772_p7 }
  0x8d   : > { %2303 = dma.done.wait (%p2774_p11), [#allocation7], 1024  }
  0x8e   : > { %2305 = vsyncadd (%p2775_p4), [#allocation7], 4294966272  ;;  %p2776_p1 = pmov %p2775_p4 }
  0x90   : > { %2307 = dma.done.wait (%p2776_p1), [#allocation10], 1024   ;;  %p2777_p0 = pmov %p2776_p1 }
  0x91   : > { %v2344_v0 = vmov 0   ;;  %v2064_v1 = vld [vmem:[#allocation3 + $0x40] sm:$0xff]   ;;  %s1639_s13 = sshll.u32 %s2328_s27, 4  ;;  %v2066_v3 = vld [vmem:[#allocation3 + $0x48] sm:$0xff]   ;;  %v2068_v5 = vld [vmem:[#allocation3 + $0x50] sm:$0xff]   ;;  %s2778_s12 = sld [smem:[#allocation20_spill]] }
  0x92   : > { %2309 = vsyncadd (%p2777_p0), [#allocation10], 4294966272  ;;  %2062 = vset.pattern.permute.xlu0 %v2344_v0  ;;  %2063 = vset.pattern.permute.xlu1 %v2344_v0  ;;  %v2065_v2 = vld [vmem:[#allocation3] sm:$0xff]   ;;  %v2067_v4 = vld [vmem:[#allocation3 + $0x8] sm:$0xff]   ;;  %p408_p9 = scmp.lt.s32.totalorder %s1639_s13, 31  ;;  %s2670_s11 = scalar_lea.vmem [#allocation11], %s2598_s22 }
  0x93   : > { %1788 = vmatprep.subr.bf16.mxu0 %v2064_v1  ;;  %v2069_v6 = vld [vmem:[#allocation3 + $0x10] sm:$0xff]   ;;  %v2070_v7 = vld [vmem:[#allocation3 + $0x58] sm:$0xff]   ;;  %v2072_v9 = vld [vmem:[#allocation3 + $0x60] sm:$0xff]   ;;  %s1479_s21 = sshll.u32 %s2670_s11, 4  ;;  %s2779_s17 = sld [smem:[#allocation18_spill]]  ;;  %s2680_s21 = int_to_ptr.vmem [resolvable:$true] %s1479_s21 }
  0x94   : > { %1789 = vmatpush3.bf16.msra.mxu0 %v2065_v2  ;;  %s2794_s13 = smov (!%p408_p9, %s1639_s13), 31  ;;  %v2071_v8 = vld [vmem:[#allocation3 + $0x18] sm:$0xff]   ;;  %v2073_v10 = vld [vmem:[#allocation3 + $0x20] sm:$0xff]   ;;  %v2074_v11 = vld [vmem:[#allocation3 + $0x68] sm:$0xff]   ;;  %s1740_s22 = sshll.u32 %s2328_s27, 10 }
  0x95   : > { %1790 = vmatprep.subr.bf16.mxu0 %v2066_v3  ;;  %s1723_s30 = sshll.u32 %s2794_s13, 3  ;;  %v2075_v13 = vld [vmem:[#allocation3 + $0x28] sm:$0xff]   ;;  %v2076_v14 = vld [vmem:[#allocation3 + $0x70] sm:$0xff]   ;;  %v2078_v16 = vld [vmem:[#allocation3 + $0x78] sm:$0xff]   ;;  %s2780_s13 = sld [smem:[#allocation21_spill]] }
  0x96   : > { %s2619_s8 = scalar_lea.vmem %s2738_s0, %s1723_s30  ;;  %v2077_v15 = vld [vmem:[#allocation3 + $0x30] sm:$0xff]   ;;  %s2625_s20 = scalar_lea.vmem %s2741_s3, %s1723_s30  ;;  %v2079_v18 = vld [vmem:[#allocation3 + $0x38] sm:$0xff]   ;;  %v2104_v26 = vld [vmem:[#allocation9] sm:$0xff]  }
  0x97   : > { %v2082_v12 = vld [vmem:[%s2619_s8 + $0x4] ss:$8 sps:$4 sm:$0xff]   ;;  %v842_v19 = vld [vmem:[%s2625_s20 + $0x10] sm:$0xff]  ;;  %v843_v21 = vld [vmem:[%s2625_s20 + $0x18] sm:$0xff]  ;;  %1884 = vmatprep.subr.bf16.mxu1 %v2104_v26  ;;  %s2691_s27 = scalar_lea.sflag [#allocation5], %s350_s16  ;;  %s2242_s10 = scalar_lea.vmem %s2680_s21, 1024 }
  0x98   : > { %1791 = vmatpush3.bf16.msra.mxu0 %v2067_v4  ;;  %684 = vmatprep.mubr.bf16.mxu0 %v2082_v12  ;;  %v840_v17 = vld [vmem:[%s2625_s20] sm:$0xff]  ;;  %v841_v20 = vld [vmem:[%s2625_s20 + $0x8] sm:$0xff]  ;;  %v2083_v23 = vld [vmem:[%s2619_s8 + $0x14] ss:$8 sps:$4 sm:$0xff]   ;;  %p2243_p3 = scmp.ne.s32.totalorder %s2680_s21, %s2242_s10  ;;  %s2345_s15 = smov [#allocation11]  }
  0x99   : > { %1792 = vmatprep.subr.bf16.mxu0 %v2068_v5  ;;  %858 = vperm.xlu0 %2062, %v840_v17   ;;  %v2080_v22 = vld [vmem:[%s2619_s8] ss:$8 sps:$4 sm:$0xff]   ;;  %v846_v28 = vld [vmem:[%s2625_s20 + $0x30] sm:$0xff]  ;;  %v847_v30 = vld [vmem:[%s2625_s20 + $0x38] sm:$0xff]  ;;  %p2781_p5 = scmp.ne.s32.totalorder %s2779_s17, 0 }
  0x9a   : > { %868 = vperm.xlu1 %2063, %v842_v19   ;;  %v844_v24 = vld [vmem:[%s2625_s20 + $0x20] sm:$0xff]  ;;  %v845_v25 = vld [vmem:[%s2625_s20 + $0x28] sm:$0xff]  ;;  %v2085_v29 = vld [vmem:[%s2619_s8 + $0x10] ss:$8 sps:$4 sm:$0xff]   ;;  %1885 = vmatpush3.bf16.msra.mxu1 %v2104_v26 }
  0x9b   : > { %v2105_v27 = vld [vmem:[#allocation9 + $0x8] sm:$0xff]   ;;  %v2106_v32 = vld [vmem:[#allocation9 + $0x10] sm:$0xff]   ;;  %v848_v33 = vld [vmem:[%s2625_s20 + $0x40] sm:$0xff]  ;;  %s2685_s30 = scalar_lea.hbm %s2780_s13, %s1740_s22  ;;  %p2244_p10 = pnand %p2243_p3, %p2781_p5 }
  0x9c   : > { %1793 = vmatpush3.bf16.msra.mxu0 %v2069_v6  ;;  %v2086_v31 = vld [vmem:[%s2619_s8 + $0x24] ss:$8 sps:$4 sm:$0xff]   ;;  %1886 = vmatprep.subr.bf16.mxu1 %v2105_v27  ;;  %v2107_v36 = vld [vmem:[#allocation9 + $0x18] sm:$0xff]   ;;  %v850_v37 = vld [vmem:[%s2625_s20 + $0x50] sm:$0xff] }
  0x9d   : > { %1794 = vmatprep.subr.bf16.mxu0 %v2070_v7  ;;  %863 = vperm.xlu0 %2062, %v841_v20   ;;  %v849_v34 = vld [vmem:[%s2625_s20 + $0x48] sm:$0xff]  ;;  %v2112_v35 = vld [vmem:[%s2601_s19] sm:$0xff]   ;;  %v851_v39 = vld [vmem:[%s2625_s20 + $0x58] sm:$0xff]  ;;  %p2245_p13 = pneg %p2244_p10 }
  0x9e   : > { %873 = vperm.xlu1 %2063, %v843_v21   ;;  %1887 = vmatpush3.bf16.msra.mxu1 %v2105_v27  ;;  %v2088_v38 = vld [vmem:[%s2619_s8 + $0x20] ss:$8 sps:$4 sm:$0xff]   ;;  %v2089_v40 = vld [vmem:[%s2619_s8 + $0x34] ss:$8 sps:$4 sm:$0xff]   ;;  %v2091_v48 = vld [vmem:[%s2619_s8 + $0x30] ss:$8 sps:$4 sm:$0xff]  }
  0x9f   : > { %1888 = vmatprep.subr.bf16.mxu1 %v2106_v32  ;;  %1900 = vmatprep.mubr.bf16.mxu1 %v2112_v35  ;;  %v2108_v41 = vld [vmem:[#allocation9 + $0x20] sm:$0xff]   ;;  %v853_v43 = vld [vmem:[%s2625_s20 + $0x68] sm:$0xff]  ;;  %v854_v45 = vld [vmem:[%s2625_s20 + $0x70] sm:$0xff] }
  0xa0   : > { %1795 = vmatpush3.bf16.msra.mxu0 %v2071_v8  ;;  %v852_v42 = vld [vmem:[%s2625_s20 + $0x60] sm:$0xff]  ;;  %v2109_v44 = vld [vmem:[#allocation9 + $0x28] sm:$0xff]   ;;  %v855_v46 = vld [vmem:[%s2625_s20 + $0x78] sm:$0xff] }
  0xa1   : > { %1796 = vmatprep.subr.bf16.mxu0 %v2072_v9  ;;  %878 = vperm.xlu0 %2062, %v844_v24   ;;  %v2110_v47 = vld [vmem:[#allocation9 + $0x30] sm:$0xff]   ;;  %v2092_v49 = vld [vmem:[%s2619_s8 + $0x44] ss:$8 sps:$4 sm:$0xff]   ;;  %v2111_v50 = vld [vmem:[#allocation9 + $0x38] sm:$0xff]  }
  0xa2   : > { %883 = vperm.xlu1 %2063, %v845_v25   ;;  %1889 = vmatpush3.bf16.msra.mxu1 %v2106_v32  ;;  %v2114_v51 = vld [vmem:[#allocation8] sm:$0xff]   ;;  %v2095_v53 = vld [vmem:[%s2619_s8 + $0x54] ss:$8 sps:$4 sm:$0xff]   ;;  %v2113_v54 = vld [vmem:[%s2601_s19 + $0x8] sm:$0xff]  }
  0xa3   : > { %1890 = vmatprep.subr.bf16.mxu1 %v2107_v36  ;;  %v2094_v52 = vld [vmem:[%s2619_s8 + $0x40] ss:$8 sps:$4 sm:$0xff]   ;;  %v2116_v55 = vld [vmem:[%s2601_s19 + $0x10] sm:$0xff]   ;;  %v2098_v59 = vld [vmem:[%s2619_s8 + $0x64] ss:$8 sps:$4 sm:$0xff]  }
  0xa4   : > { %1797 = vmatpush3.bf16.msra.mxu0 %v2073_v10  ;;  %v2115_v56 = vld [vmem:[#allocation8 + $0x8] sm:$0xff]   ;;  %v2118_v57 = vld [vmem:[#allocation8 + $0x10] sm:$0xff]   ;;  %v2117_v60 = vld [vmem:[%s2601_s19 + $0x18] sm:$0xff]  }
  0xa5   : > { %1798 = vmatprep.subr.bf16.mxu0 %v2074_v11  ;;  %888 = vperm.xlu0 %2062, %v846_v28   ;;  %v2097_v58 = vld [vmem:[%s2619_s8 + $0x50] ss:$8 sps:$4 sm:$0xff]   ;;  %v2100_v62 = vld [vmem:[%s2619_s8 + $0x60] ss:$8 sps:$4 sm:$0xff]   ;;  %v2101_v63 = vld [vmem:[%s2619_s8 + $0x74] ss:$8 sps:$4 sm:$0xff]  }
  0xa6   : > { %893 = vperm.xlu1 %2063, %v847_v30   ;;  %1891 = vmatpush3.bf16.msra.mxu1 %v2107_v36  ;;  %v2119_v61 = vld [vmem:[#allocation8 + $0x18] sm:$0xff]   ;;  %v2120_v1 = vld [vmem:[%s2601_s19 + $0x20] sm:$0xff]   ;;  %v2121_v2 = vld [vmem:[%s2601_s19 + $0x28] sm:$0xff]  }
  0xa7   : > { %1892 = vmatprep.subr.bf16.mxu1 %v2108_v41  ;;  %v2103_v0 = vld [vmem:[%s2619_s8 + $0x70] ss:$8 sps:$4 sm:$0xff]   ;;  %v2122_v3 = vld [vmem:[#allocation8 + $0x20] sm:$0xff]   ;;  %v2123_v4 = vld [vmem:[#allocation8 + $0x28] sm:$0xff]   ;;  %s2246_s8 = sshll.u32 %s2345_s15, 4  ;;  %s2247_s8 = int_to_ptr.vmem [resolvable:$false] %s2246_s8 }
  0xa8   : > { %1799 = vmatpush3.bf16.msra.mxu0 %v2075_v13  ;;  %v2124_v5 = vld [vmem:[%s2601_s19 + $0x30] sm:$0xff]   ;;  %v2125_v6 = vld [vmem:[%s2601_s19 + $0x38] sm:$0xff]   ;;  %s2248_s7 = scalar_lea.vmem %s2247_s8, 2048  ;;  %p2249_p2 = scmp.lt.s32.totalorder %s2680_s21, %s2247_s8 }
  0xa9   : > { %1800 = vmatprep.subr.bf16.mxu0 %v2076_v14  ;;  %898 = vperm.xlu0 %2062, %v848_v33   ;;  %v2126_v7 = vld [vmem:[#allocation8 + $0x30] sm:$0xff]   ;;  %v2127_v8 = vld [vmem:[#allocation8 + $0x38] sm:$0xff]   ;;  %p2250_p8 = scmp.lt.s32.totalorder %s2248_s7, %s2242_s10 }
  0xaa   : > { %903 = vperm.xlu1 %2063, %v849_v34   ;;  %1893 = vmatpush3.bf16.msra.mxu1 %v2108_v41 }
  0xab   : > { %1894 = vmatprep.subr.bf16.mxu1 %v2109_v44  ;;  %p2251_p12 = por %p2250_p8, %p2249_p2 }
  0xac   : > { %1801 = vmatpush3.bf16.msra.mxu0 %v2077_v15 }
  0xad   : > { %1802 = vmatprep.subr.bf16.mxu0 %v2078_v16  ;;  %908 = vperm.xlu0 %2062, %v850_v37   ;;  %p2252_p7 = pnand %p2251_p12, %p2245_p13 }
  0xae   : > { %913 = vperm.xlu1 %2063, %v851_v39   ;;  %1895 = vmatpush3.bf16.msra.mxu1 %v2109_v44 }
  0xaf   : > { %1896 = vmatprep.subr.bf16.mxu1 %v2110_v47 }
  0xb0   : > { %1803 = vmatpush3.bf16.msra.mxu0 %v2079_v18 }
  0xb1   : > { %918 = vperm.xlu0 %2062, %v852_v42  }
  0xb2   : > { %923 = vperm.xlu1 %2063, %v853_v43   ;;  %1897 = vmatpush3.bf16.msra.mxu1 %v2110_v47 }
  0xb3   : > { %685 = vmatmul.mubr.bf16.vlgmr.msra.gmra.mrb[0].mxu0 %v2080_v22  ;;  %1898 = vmatprep.subr.bf16.mxu1 %v2111_v50 }
  0xb4   : > { %692 = vmatprep.mubr.bf16.mxu0 %v2083_v23 }
  0xb5   : > { %928 = vperm.xlu0 %2062, %v854_v45  }
  0xb6   : > { %933 = vperm.xlu1 %2063, %v855_v46   ;;  %1899 = vmatpush3.bf16.msra.mxu1 %v2111_v50 }
  0xb7   : > { %1916 = vmatprep.subr.bf16.mxu1 %v2114_v51 }
  0xb9   : > { %1901 = vmatmul.mubr.bf16.vlgmr.msra.gmra.mrb[0].mxu1 %v2113_v54 }
  0xba   : > { %1917 = vmatpush3.bf16.msra.mxu1 %v2114_v51  ;;  %1904 = vmatprep.mubr.bf16.mxu1 %v2116_v55 }
  0xbb   : > { %693 = vmatmul.mubr.bf16.gmra.mrb[4].mxu0 %v2085_v29  ;;  %1918 = vmatprep.subr.bf16.mxu1 %v2115_v56 }
  0xbc   : > { %700 = vmatprep.mubr.bf16.mxu0 %v2086_v31 }
  0xbe   : > { %1919 = vmatpush3.bf16.msra.mxu1 %v2115_v56 }
  0xbf   : > { %1920 = vmatprep.subr.bf16.mxu1 %v2118_v57 }
  0xc1   : > { %1905 = vmatmul.mubr.bf16.gmra.mrb[4].mxu1 %v2117_v60 }
  0xc2   : > { %1921 = vmatpush3.bf16.msra.mxu1 %v2118_v57  ;;  %1908 = vmatprep.mubr.bf16.mxu1 %v2120_v1 }
  0xc3   : > { %701 = vmatmul.mubr.bf16.gmra.mrb[8].mxu0 %v2088_v38  ;;  %1922 = vmatprep.subr.bf16.mxu1 %v2119_v61 }
  0xc4   : > { %708 = vmatprep.mubr.bf16.mxu0 %v2089_v40 }
  0xc6   : > { %1923 = vmatpush3.bf16.msra.mxu1 %v2119_v61 }
  0xc7   : > { %1924 = vmatprep.subr.bf16.mxu1 %v2122_v3 }
  0xc9   : > { %1909 = vmatmul.mubr.bf16.gmra.mrb[8].mxu1 %v2121_v2 }
  0xca   : > { %1925 = vmatpush3.bf16.msra.mxu1 %v2122_v3  ;;  %1912 = vmatprep.mubr.bf16.mxu1 %v2124_v5 }
  0xcb   : > { %709 = vmatmul.mubr.bf16.gmra.mrb[12].mxu0 %v2091_v48  ;;  %1926 = vmatprep.subr.bf16.mxu1 %v2123_v4 }
  0xcc   : > { %716 = vmatprep.mubr.bf16.mxu0 %v2092_v49 }
  0xce   : > { %1927 = vmatpush3.bf16.msra.mxu1 %v2123_v4 }
  0xcf   : > { %1928 = vmatprep.subr.bf16.mxu1 %v2126_v7 }
  0xd1   : > { %1913 = vmatmul.mubr.bf16.gmra.mrb[12].mxu1 %v2125_v6 }
  0xd2   : > { %1929 = vmatpush3.bf16.msra.mxu1 %v2126_v7 }
  0xd3   : > { %717 = vmatmul.mubr.bf16.gmra.mrb[16].mxu0 %v2094_v52  ;;  %1930 = vmatprep.subr.bf16.mxu1 %v2127_v8 }
  0xd4   : > { %724 = vmatprep.mubr.bf16.mxu0 %v2095_v53 }
  0xd6   : > { %1931 = vmatpush3.bf16.msra.mxu1 %v2127_v8 }
  0xdb   : > { %725 = vmatmul.mubr.bf16.gmra.mrb[20].mxu0 %v2097_v58 }
  0xdc   : > { %732 = vmatprep.mubr.bf16.mxu0 %v2098_v59 }
  0xe3   : > { %733 = vmatmul.mubr.bf16.gmra.mrb[24].mxu0 %v2100_v62 }
  0xe4   : > { %740 = vmatprep.mubr.bf16.mxu0 %v2101_v63 }
  0xeb   : > { %741 = vmatmul.mubr.bf16.gmra.mrb[28].mxu0 %v2103_v0 }
 0x118   : > { %v859_v9 = vpop.permute.xlu0 %858 }
 0x119   : > { %v869_v19 = vpop.permute.xlu1 %868 }
 0x11c   : > { %v864_v15 = vpop.permute.xlu0 %863 }
 0x11d   : > { %v874_v27 = vpop.permute.xlu1 %873 }
 0x120   : > { %v879_v37 = vpop.permute.xlu0 %878 }
 0x121   : > { %v884_v38 = vpop.permute.xlu1 %883 }
 0x124   : > { %v889_v48 = vpop.permute.xlu0 %888 }
 0x125   : > { %v894_v49 = vpop.permute.xlu1 %893 }
 0x128   : > { %v899_v59 = vpop.permute.xlu0 %898 }
 0x129   : > { %v904_v60 = vpop.permute.xlu1 %903 }
 0x12c   : > { %v909_v6 = vpop.permute.xlu0 %908 }
 0x12d   : > { %v914_v7 = vpop.permute.xlu1 %913 }
 0x186   : > { %v1804_v10 = vpop.f32.mrb[0].mxu0 }
 0x187   : > { %v1805_v11 = vpop.f32.mrb[1].mxu0 }
 0x188   : > { %v1806_v12 = vadd.f32 %v1805_v11, %v1804_v10  ;;  %v1807_v13 = vpop.f32.mrb[2].mxu0 }
 0x189   : > { %v1808_v14 = vpop.f32.mrb[3].mxu0 }
 0x18a   : > { %v1809_v16 = vadd.f32 %v1808_v14, %v1807_v13  ;;  %v936_v17 = vmul.f32 %v1806_v12, %v859_v9 }
 0x18c   : > { %v937_v18 = vmul.f32 %v1809_v16, %v864_v15 }
 0x18e   : > { %v952_v20 = vpack.c.bf16 %v937_v18, %v936_v17  ;;  %v1810_v21 = vpop.f32.mrb[4].mxu0  ;;  %v919_v17 = vpop.permute.xlu0 %918 }
 0x18f   : > { %v1811_v22 = vpop.f32.mrb[5].mxu0  ;;  %v924_v18 = vpop.permute.xlu1 %923 }
 0x190   : > { %v1812_v23 = vadd.f32 %v1811_v22, %v1810_v21  ;;  %v1813_v24 = vpop.f32.mrb[6].mxu0  ;;  %1932 = vmatprep.mubr.bf16.mxu1 %v952_v20 }
 0x191   : > { %v1814_v25 = vpop.f32.mrb[7].mxu0 }
 0x192   : > { %v1815_v26 = vadd.f32 %v1814_v25, %v1813_v24  ;;  %v938_v28 = vmul.f32 %v1812_v23, %v869_v19 }
 0x194   : > { %v939_v29 = vmul.f32 %v1815_v26, %v874_v27 }
 0x196   : > { %v953_v30 = vpack.c.bf16 %v939_v29, %v938_v28  ;;  %v1816_v31 = vpop.f32.mrb[8].mxu0  ;;  %v929_v28 = vpop.permute.xlu0 %928 }
 0x197   : > { %v1817_v32 = vpop.f32.mrb[9].mxu0  ;;  %v934_v29 = vpop.permute.xlu1 %933 }
 0x198   : > { %v1818_v33 = vadd.f32 %v1817_v32, %v1816_v31  ;;  %v1819_v34 = vpop.f32.mrb[10].mxu0  ;;  %1933 = vmatmul.mubr.bf16.vlgmr.msra.gmra.mrb[0].mxu1 %v953_v30 }
 0x199   : > { %v1820_v35 = vpop.f32.mrb[11].mxu0 }
 0x19a   : > { %v1821_v36 = vadd.f32 %v1820_v35, %v1819_v34  ;;  %v940_v39 = vmul.f32 %v1818_v33, %v879_v37  ;;  %v1700_v33 = vld [vmem:[%s2778_s12] ss:$0 sm:$0xff] }
 0x19c   : > { %v941_v40 = vmul.f32 %v1821_v36, %v884_v38 }
 0x19e   : > { %v1822_v41 = vpop.f32.mrb[12].mxu0  ;;  %v954_v42 = vpack.c.bf16 %v941_v40, %v940_v39 }
 0x19f   : > { %v1823_v43 = vpop.f32.mrb[13].mxu0 }
 0x1a0   : > { %v1824_v44 = vadd.f32 %v1823_v43, %v1822_v41  ;;  %v1825_v45 = vpop.f32.mrb[14].mxu0  ;;  %1936 = vmatprep.mubr.bf16.mxu1 %v954_v42 }
 0x1a1   : > { %v1826_v46 = vpop.f32.mrb[15].mxu0 }
 0x1a2   : > { %v1827_v47 = vadd.f32 %v1826_v46, %v1825_v45  ;;  %v942_v50 = vmul.f32 %v1824_v44, %v889_v48 }
 0x1a4   : > { %v943_v51 = vmul.f32 %v1827_v47, %v894_v49 }
 0x1a6   : > { %v1828_v52 = vpop.f32.mrb[16].mxu0  ;;  %v955_v53 = vpack.c.bf16 %v943_v51, %v942_v50 }
 0x1a7   : > { %v1829_v54 = vpop.f32.mrb[17].mxu0 }
 0x1a8   : > { %v1830_v55 = vadd.f32 %v1829_v54, %v1828_v52  ;;  %v1831_v56 = vpop.f32.mrb[18].mxu0  ;;  %1937 = vmatmul.mubr.bf16.gmra.mrb[4].mxu1 %v955_v53 }
 0x1a9   : > { %v1832_v57 = vpop.f32.mrb[19].mxu0 }
 0x1aa   : > { %v1833_v58 = vadd.f32 %v1832_v57, %v1831_v56  ;;  %v944_v61 = vmul.f32 %v1830_v55, %v899_v59 }
 0x1ac   : > { %v945_v62 = vmul.f32 %v1833_v58, %v904_v60 }
 0x1ae   : > { %v1834_v63 = vpop.f32.mrb[20].mxu0  ;;  %v956_v0 = vpack.c.bf16 %v945_v62, %v944_v61 }
 0x1af   : > { %v1835_v1 = vpop.f32.mrb[21].mxu0 }
 0x1b0   : > { %v1836_v2 = vadd.f32 %v1835_v1, %v1834_v63  ;;  %v1837_v3 = vpop.f32.mrb[22].mxu0  ;;  %1940 = vmatprep.mubr.bf16.mxu1 %v956_v0 }
 0x1b1   : > { %v1838_v4 = vpop.f32.mrb[23].mxu0 }
 0x1b2   : > { %v1839_v5 = vadd.f32 %v1838_v4, %v1837_v3  ;;  %v946_v8 = vmul.f32 %v1836_v2, %v909_v6 }
 0x1b4   : > { %v947_v9 = vmul.f32 %v1839_v5, %v914_v7 }
 0x1b6   : > { %v1840_v10 = vpop.f32.mrb[24].mxu0  ;;  %v957_v11 = vpack.c.bf16 %v947_v9, %v946_v8 }
 0x1b7   : > { %v1841_v12 = vpop.f32.mrb[25].mxu0 }
 0x1b8   : > { %v1842_v13 = vadd.f32 %v1841_v12, %v1840_v10  ;;  %v1843_v14 = vpop.f32.mrb[26].mxu0  ;;  %1941 = vmatmul.mubr.bf16.gmra.mrb[8].mxu1 %v957_v11 }
 0x1b9   : > { %v1844_v15 = vpop.f32.mrb[27].mxu0 }
 0x1ba   : > { %v1845_v16 = vadd.f32 %v1844_v15, %v1843_v14  ;;  %v948_v19 = vmul.f32 %v1842_v13, %v919_v17 }
 0x1bc   : > { %v949_v20 = vmul.f32 %v1845_v16, %v924_v18 }
 0x1be   : > { %v1846_v21 = vpop.f32.mrb[28].mxu0  ;;  %v958_v22 = vpack.c.bf16 %v949_v20, %v948_v19 }
 0x1bf   : > { %v1847_v23 = vpop.f32.mrb[29].mxu0 }
 0x1c0   : > { %v1848_v24 = vadd.f32 %v1847_v23, %v1846_v21  ;;  %v1849_v25 = vpop.f32.mrb[30].mxu0  ;;  %1944 = vmatprep.mubr.bf16.mxu1 %v958_v22 }
 0x1c1   : > { %v1850_v26 = vpop.f32.mrb[31].mxu0 }
 0x1c2   : > { %v1851_v27 = vadd.f32 %v1850_v26, %v1849_v25  ;;  %v950_v30 = vmul.f32 %v1848_v24, %v929_v28 }
 0x1c4   : > { %v951_v31 = vmul.f32 %v1851_v27, %v934_v29 }
 0x1c6   : > { %v959_v32 = vpack.c.bf16 %v951_v31, %v950_v30 }
 0x1c8   : > { %1945 = vmatmul.mubr.bf16.gmra.mrb[12].mxu1 %v959_v32 }
 0x26b   : > { %v1934_v34 = vpop.f32.mrb[0].mxu1 }
 0x26c   : > { %v1355_v35 = vadd.f32 %v1934_v34, %v1700_v33  ;;  %v1283_v36 = vpop.f32.mrb[1].mxu1 }
 0x26d   : > { %v1353_v37 = vadd.f32 %v1700_v33, %v1283_v36  ;;  %v1935_v38 = vpop.f32.mrb[2].mxu1 }
 0x26e   : > { %v1356_v39 = vadd.f32 %v1935_v38, %v1700_v33  ;;  %v1286_v40 = vpop.f32.mrb[3].mxu1  ;;  %v1371_v42 = vmax.f32 %v1355_v35, 0.0 }
 0x26f   : > { %v1354_v41 = vadd.f32 %v1700_v33, %v1286_v40  ;;  %v1369_v44 = vmax.f32 %v1353_v37, 0.0 }
 0x270   : > { %v1372_v43 = vmax.f32 %v1356_v39, 0.0 }
 0x271   : > { %v1370_v45 = vmax.f32 %v1354_v41, 0.0 }
 0x272   : > { %v1749_v46 = vpack.c.bf16 %v1372_v43, %v1371_v42 }
 0x273   : > { %v1744_v47 = vpack.c.bf16 %v1370_v45, %v1369_v44 }
 0x274   : > { %1781 = vst [vmem:[%s2670_s11 + $0x8] sm:$0xff] %v1749_v46  }
 0x275   : > { %1745 = vst [vmem:[%s2670_s11] sm:$0xff] %v1744_v47  }
 0x27b   : > { %v1938_v48 = vpop.f32.mrb[4].mxu1 }
 0x27c   : > { %v1359_v49 = vadd.f32 %v1938_v48, %v1700_v33  ;;  %v1299_v50 = vpop.f32.mrb[5].mxu1 }
 0x27d   : > { %v1357_v51 = vadd.f32 %v1700_v33, %v1299_v50  ;;  %v1939_v52 = vpop.f32.mrb[6].mxu1 }
 0x27e   : > { %v1360_v53 = vadd.f32 %v1939_v52, %v1700_v33  ;;  %v1302_v54 = vpop.f32.mrb[7].mxu1  ;;  %v1375_v56 = vmax.f32 %v1359_v49, 0.0 }
 0x27f   : > { %v1358_v55 = vadd.f32 %v1700_v33, %v1302_v54  ;;  %v1373_v58 = vmax.f32 %v1357_v51, 0.0 }
 0x280   : > { %v1376_v57 = vmax.f32 %v1360_v53, 0.0 }
 0x281   : > { %v1374_v59 = vmax.f32 %v1358_v55, 0.0 }
 0x282   : > { %v1759_v60 = vpack.c.bf16 %v1376_v57, %v1375_v56 }
 0x283   : > { %v1754_v61 = vpack.c.bf16 %v1374_v59, %v1373_v58 }
 0x284   : > { %1783 = vst [vmem:[%s2670_s11 + $0x18] sm:$0xff] %v1759_v60  }
 0x285   : > { %1782 = vst [vmem:[%s2670_s11 + $0x10] sm:$0xff] %v1754_v61  }
 0x28b   : > { %v1942_v62 = vpop.f32.mrb[8].mxu1 }
 0x28c   : > { %v1363_v63 = vadd.f32 %v1942_v62, %v1700_v33  ;;  %v1315_v0 = vpop.f32.mrb[9].mxu1 }
 0x28d   : > { %v1361_v1 = vadd.f32 %v1700_v33, %v1315_v0  ;;  %v1943_v2 = vpop.f32.mrb[10].mxu1 }
 0x28e   : > { %v1364_v3 = vadd.f32 %v1943_v2, %v1700_v33  ;;  %v1318_v4 = vpop.f32.mrb[11].mxu1  ;;  %v1379_v6 = vmax.f32 %v1363_v63, 0.0 }
 0x28f   : > { %v1362_v5 = vadd.f32 %v1700_v33, %v1318_v4  ;;  %v1377_v8 = vmax.f32 %v1361_v1, 0.0 }
 0x290   : > { %v1380_v7 = vmax.f32 %v1364_v3, 0.0 }
 0x291   : > { %v1378_v9 = vmax.f32 %v1362_v5, 0.0 }
 0x292   : > { %v1769_v10 = vpack.c.bf16 %v1380_v7, %v1379_v6 }
 0x293   : > { %v1764_v11 = vpack.c.bf16 %v1378_v9, %v1377_v8 }
 0x294   : > { %1785 = vst [vmem:[%s2670_s11 + $0x28] sm:$0xff] %v1769_v10  }
 0x295   : > { %1784 = vst [vmem:[%s2670_s11 + $0x20] sm:$0xff] %v1764_v11  }
 0x29b   : > { %v1946_v12 = vpop.f32.mrb[12].mxu1 }
 0x29c   : > { %v1367_v13 = vadd.f32 %v1946_v12, %v1700_v33  ;;  %v1331_v14 = vpop.f32.mrb[13].mxu1 }
 0x29d   : > { %v1365_v15 = vadd.f32 %v1700_v33, %v1331_v14  ;;  %v1947_v16 = vpop.f32.mrb[14].mxu1 }
 0x29e   : > { %v1368_v17 = vadd.f32 %v1947_v16, %v1700_v33  ;;  %v1334_v18 = vpop.f32.mrb[15].mxu1  ;;  %v1383_v20 = vmax.f32 %v1367_v13, 0.0 }
 0x29f   : > { %v1366_v19 = vadd.f32 %v1700_v33, %v1334_v18  ;;  %v1381_v22 = vmax.f32 %v1365_v15, 0.0 }
 0x2a0   : > { %v1384_v21 = vmax.f32 %v1368_v17, 0.0 }
 0x2a1   : > { %v1382_v23 = vmax.f32 %v1366_v19, 0.0 }
 0x2a2   : > { %v1779_v24 = vpack.c.bf16 %v1384_v21, %v1383_v20 }
 0x2a3   : > { %v1774_v25 = vpack.c.bf16 %v1382_v23, %v1381_v22 }
 0x2a4   : > { %1787 = vst [vmem:[%s2670_s11 + $0x38] sm:$0xff] %v1779_v24  }
 0x2a5   : > { %1786 = vst [vmem:[%s2670_s11 + $0x30] sm:$0xff] %v1774_v25  }
 0x2a6   : > { %2255 = shalt.err (!%p2252_p7)
}
 0x2a7   : > { %s2256_s16 = scalar_lea.hbm %s2685_s30, 1024  ;;  %s2260_s14 = scalar_lea.hbm %s2780_s13, 2048 }
 0x2a8   : > { %p2257_p6 = scmp.ne.s32.totalorder %s2685_s30, %s2256_s16  ;;  %p2261_p1 = scmp.lt.u32.totalorder %s2685_s30, %s2780_s13 }
 0x2a9   : > { %p2262_p0 = scmp.lt.u32.totalorder %s2260_s14, %s2256_s16  ;;  %p2264_p3 = scmp.lt.u32.totalorder %s2256_s16, %s2685_s30 }
 0x2aa   : > { %p2258_p11 = pnand %p2257_p6, %p2781_p5 }
 0x2ab   : > { %p2263_p9 = por %p2262_p0, %p2261_p1 }
 0x2ac   : > { %p2259_p4 = pneg %p2258_p11 }
 0x2ad   : > { %p2265_p10 = por %p2264_p3, %p2263_p9 }
 0x2af   : > { %p2266_p13 = pnand %p2265_p10, %p2259_p4 }
 0x2b1   : > { %2269 = shalt.err (!%p2266_p13)
}
 0x2b2   : > { %s2346_s11 = smov 64   ;;  %s2347_s22 = smov 4  }
 0x2b3   : > { %1978 = dma.vmem_to_hbm [thread:$0]  (%p2781_p5), %s2680_s21, 1024, %s2685_s30, %s2691_s27, %s2346_s11, %s2346_s11, %s2347_s22  }
 0x2b4 PF: > { %s2782_s18 = sld [smem:[#allocation17_spill]]  ;;  %s2783_s19 = sld [smem:[#allocation19_spill]] }
 0x2b5   : > { %p2785_p8 = scmp.ge.s32.totalorder %s2336_s29, 2 }
 0x2ba   : > { %s1494_s10 = sand.u32 1, %s2782_s18   ;;  %p2784_p2 = scmp.ne.s32.totalorder %s2783_s19, 0 }
 0x2bb   : > { %s1495_s15 = scalar_lea.sflag [#allocation5], %s1494_s10 }
 0x2bc   : > { %p1995_p12 = pnand %p2785_p8, %p2784_p2 }
 0x2be   : > { %2311 = dma.done.wait (!%p1995_p12), %s1495_s15, 1024  }
 0x2bf   : > { %2313 = vsyncadd (!%p1995_p12), %s1495_s15, 4294966272  ;;  %s25_s29 = sadd.s32 1, %s2336_s29   ;;  %s2786_s24 = smov %s2320_s25 }
 0x2c0   : > { %p22_p7 = scmp.ge.s32.totalorder %s25_s29, 4   ;;  %s2787_s25 = smov %s2324_s26 }
 0x2c1   : > { %s2788_s26 = smov %s2553_s6  ;;  %s2789_s27 = smov %s2332_s28 }
 0x2c2   : > { %s2790_s28 = smov %s2792_s23  ;;  %24 = sbr.rel (!%p22_p7) target bundleno = 11 (0xb), region = 125 }
 0x2c9   :  { %1500 = vsyncpa [#allocation4], 1 }
 0x2ca   :  { %1502 = vsyncpa [#allocation4 + $0x1], 1 }
 0x2cb   :  { %1503 = vsyncpa [#allocation7], 1 }
 0x2cc   :  { %1505 = vsyncpa [#allocation7 + $0x1], 1 }
 0x2cd   :  { %1506 = vsyncpa [#allocation10], 1 }
 0x2ce   :  { %1507 = vsyncpa [#allocation5], 1 }
 0x2cf   :  { %1509 = vsyncpa [#allocation5 + $0x1], 1 }

</bundles_post_ra>
